<compile_context>
chip_gen: v7x
topology: tpu7x:2x2x1
jax: 0.10.0
libtpu: 0.0.40
codegen_flags: <defaults>
</compile_context>

<pallas_src>
import jax
import jax.numpy as jnp
from jax.experimental import pallas as pl
from jax.experimental.pallas import tpu as pltpu

LANES = 128                     # vreg lane count (fast / last axis)
SUBLANES = 8                    # f32 vreg sublane count
BLOCK_BYTES = 4 * 1024 * 1024   # ~4 MiB per block, independent of dtype

# Inputs smaller than this skip pallas_call (launch overhead would dominate).
# Kept deliberately tiny so the small demo inputs below still exercise the kernel;
# in production a ~64K–256K element cutoff is the right setting.
_PALLAS_MIN_ELEMS = SUBLANES * LANES  # 1024


def _round_up(v, m):
    return ((v + m - 1) // m) * m


def _swish_kernel(x_ref, o_ref):
    # swish / SiLU: x * sigmoid(x), with sigmoid(x) = 0.5 * (1 + tanh(x/2)).
    # Algebraic form y = h*tanh(h) + h with h = 0.5*x: exact, numerically stable
    # for large |x|, one EUP transcendental per element, and only `h` (not the
    # upcast x) has to stay live across the tanh -> smaller VMEM intermediates.
    h = 0.5 * x_ref[...].astype(jnp.float32)
    t = jnp.tanh(h)
    o_ref[...] = (h * t + h).astype(o_ref.dtype)


def swish(x):
    """Elementwise x * sigmoid(x); matches the PyTorch Swish module."""
    orig_shape = x.shape
    orig_dtype = x.dtype
    n = x.size

    # Tiny-input fast path: plain JAX, avoids fixed pallas_call overhead.
    if n < _PALLAS_MIN_ELEMS:
        xf = x.astype(jnp.float32)
        return (xf * jax.nn.sigmoid(xf)).astype(orig_dtype)

    itemsize = jnp.dtype(orig_dtype).itemsize
    # Sublane-packing granularity for row tiles: 8 rows f32, 16 bf16, 32 int8.
    sub = SUBLANES * max(1, 4 // itemsize)

    flat = x.reshape(-1)

    # Pad only to a multiple of 128 lanes (<= 127 elements). Zero padding is safe
    # since swish(0) == 0 and the pad is sliced off afterwards. Conv activations
    # (n % 128 == 0) take the zero-copy path: no concatenate in, no slice out.
    n_pad = (-n) % LANES
    padded = n_pad != 0
    if padded:
        flat = jnp.pad(flat, (0, n_pad))

    rows = flat.shape[0] // LANES
    x2d = flat.reshape(rows, LANES)          # lane-dense slab

    # Constant block *bytes* across dtypes (~4 MiB): 8192 rows f32, 16384 rows bf16.
    block_rows = BLOCK_BYTES // (LANES * itemsize)
    if rows > block_rows:
        row_tile = block_rows                # always a multiple of `sub`
    else:
        # Whole tensor fits in one block: split into >=2 grid steps so both v7x
        # TensorCores get work (harmless extra ~0.35 µs step on single-TC v5e/v6e).
        half = _round_up(pl.cdiv(rows, 2), sub)
        row_tile = half if half < rows else rows   # block == full dims if unsplittable
    grid = (pl.cdiv(rows, row_tile),)        # ragged last block is boundary-masked

    out2d = pl.pallas_call(
        _swish_kernel,
        out_shape=jax.ShapeDtypeStruct((rows, LANES), orig_dtype),
        grid_spec=pltpu.PrefetchScalarGridSpec(
            num_scalar_prefetch=0,
            grid=grid,
            in_specs=[pl.BlockSpec((row_tile, LANES), lambda i: (i, 0))],
            out_specs=pl.BlockSpec((row_tile, LANES), lambda i: (i, 0)),
        ),
        compiler_params=pltpu.CompilerParams(
            dimension_semantics=("parallel",),
            # 2x4 MiB in + 2x4 MiB out double-buffers + f32 upcast intermediates
            # stay well under 48 MiB; safe on v7x (64 MiB physical) and v5e/v6e.
            vmem_limit_bytes=48 * 1024 * 1024,
        ),
        cost_estimate=pl.CostEstimate(
            flops=4 * n,
            transcendentals=n,
            bytes_accessed=2 * n * itemsize,
        ),
    )(x2d)

    out = out2d.reshape(-1)
    if padded:
        out = out[:n]
    return out.reshape(orig_shape)


if __name__ == "__main__":
    key = jax.random.PRNGKey(0)
    k1, k2, k3 = jax.random.split(key, 3)

    # Small NCHW activation, as Swish is used inside MoViNet blocks.
    # rows=16 f32 -> split into 2 grid steps (v7x megacore path).
    x = jax.random.normal(k1, (2, 4, 16, 16), dtype=jnp.float32)
    y = jax.block_until_ready(swish(x))
    ref = x * jax.nn.sigmoid(x)
    assert y.shape == x.shape and y.dtype == x.dtype
    assert float(jnp.max(jnp.abs(y - ref))) < 1e-3, "f32 mismatch vs reference"

    # Larger NCTHW (3-D conv) activation in bf16: exercises the dtype-aware row
    # tile (constant block bytes) and the multi-step parallel grid.
    xb = jax.random.normal(k2, (2, 20, 8, 32, 32), dtype=jnp.float32).astype(
        jnp.bfloat16)
    yb = jax.block_until_ready(swish(xb))
    xbf = xb.astype(jnp.float32)
    refb = (xbf * jax.nn.sigmoid(xbf)).astype(jnp.bfloat16)
    assert yb.shape == xb.shape and yb.dtype == jnp.bfloat16
    diff = jnp.max(jnp.abs(yb.astype(jnp.float32) - refb.astype(jnp.float32)))
    assert float(diff) < 5e-2, "bf16 mismatch vs reference"

    # Ragged shape (n % 128 != 0): exercises the 128-element pad path and the
    # boundary-masked last block (rows=9, tile=8 -> blocks of 8 and 1).
    xr = jax.random.normal(k3, (2, 3, 171), dtype=jnp.float32)
    yr = jax.block_until_ready(swish(xr))
    refr = xr * jax.nn.sigmoid(xr)
    assert yr.shape == xr.shape and yr.dtype == xr.dtype
    assert float(jnp.max(jnp.abs(yr - refr))) < 1e-3, "ragged mismatch vs reference"

    print("KERNEL_OK")
</pallas_src>

<mosaic_0001>
module attributes {stable_mosaic.version = 11 : i64} {
  func.func @_swish_kernel(%arg0: i32, %arg1: memref<8x128xf32, #tpu.memory_space<vmem>>, %arg2: memref<8x128xf32, #tpu.memory_space<vmem>>) attributes {dimension_semantics = [#tpu.dimension_semantics<parallel>], iteration_bounds = array<i64: 2>, scalar_prefetch = 0 : i64, scratch_operands = 0 : i64, tpu.core_type = #tpu.core_type<tc>, window_params = [{transform_indices = @transform_0, window_bounds = array<i64: 8, 128>}, {transform_indices = @transform_1, window_bounds = array<i64: 8, 128>}]} {
    %c0 = arith.constant 0 : index
    %c0_0 = arith.constant 0 : index
    %0 = vector.load %arg1[%c0, %c0_0] : memref<8x128xf32, #tpu.memory_space<vmem>>, vector<8x128xf32>
    %cst = arith.constant 5.000000e-01 : f32
    %1 = vector.broadcast %cst : f32 to vector<8x128xf32>
    %2 = arith.mulf %1, %0 : vector<8x128xf32>
    %3 = math.tanh %2 : vector<8x128xf32>
    %4 = arith.mulf %2, %3 : vector<8x128xf32>
    %5 = arith.addf %4, %2 : vector<8x128xf32>
    %c0_1 = arith.constant 0 : index
    %c0_2 = arith.constant 0 : index
    %6 = vector.load %arg2[%c0_1, %c0_2] : memref<8x128xf32, #tpu.memory_space<vmem>>, vector<8x128xf32>
    tpu.vector_store %arg2[%c0_1, %c0_2], %5 {strides = array<i32>} : memref<8x128xf32, #tpu.memory_space<vmem>>, vector<8x128xf32>,
    return
  }
  func.func @transform_0(%arg0: i32) -> (i32, i32) {
    %c0_i32 = arith.constant 0 : i32
    %c0_i32_0 = arith.constant 0 : i32
    return %arg0, %c0_i32 : i32, i32
  }
  func.func @transform_1(%arg0: i32) -> (i32, i32) {
    %c0_i32 = arith.constant 0 : i32
    %c0_i32_0 = arith.constant 0 : i32
    return %arg0, %c0_i32 : i32, i32
  }
}

</mosaic_0001>

<bundles_post_ra>
// kernel: tpu_custom_call.1
= control target key start
LH: loop header
LB: loop body
LE: loop exit
PB: predicated region body
PF: predicated region fallthrough
CT: control target
= control target key end

     0   :  { %6 = vsyncpa [#allocation3], 0  ;;  %s553_s0 = inlined_call_operand.hbm [shape: f32[16,128], index: 0, kind: input, shape index: {}]   ;;  %s554_s1 = inlined_call_operand.hbm [shape: f32[16,128], index: 1, kind: output, shape index: {}]  }
   0x1   :  { %8 = vsyncpa [#allocation3 + $0x1], 0 }
   0x2   :  { %9 = vsyncpa [#allocation4], 0 }
   0x3   :  { %11 = vsyncpa [#allocation4 + $0x1], 0  ;;  %s392_s6 = smov 0   ;;  %s394_s7 = smov 0  }
   0x4   :  { %s396_s8 = smov 0   ;;  %s398_s9 = smov 0  }
   0x5 LB: > { %s413_s10 = sadd.s32 4294967295, %s378_s9   ;;  %s222_s11 = sadd.s32 4294967294, %s378_s9   ;;  %s378_s9 = sphi %s398_s9, %s569_s9   ;;  %s374_s8 = sphi %s396_s8, %s568_s8   ;;  %s370_s7 = sphi %s394_s7, %s567_s7   ;;  %s366_s6 = sphi %s392_s6, %s566_s6  }
   0x6   : > { %s417_s12 = sadd.s32 1, %s378_s9   ;;  %s24_s13 = sadd.s32 1, %s374_s8 }
   0x7   : > { %s21_s14 = ssub.s32 %s378_s9, %s417_s12  ;;  %p31_p0 = scmp.ne.s32.totalorder %s374_s8, %s370_s7 }
   0x8   : > { %p22_p1 = scmp.eq.s32.totalorder %s21_s14, 0  ;;  %p32_p2 = scmp.eq.s32.totalorder %s378_s9, 0 }
   0x9   : > { %p37_p3 = scmp.ne.s32.totalorder %s370_s7, %s366_s6  ;;  %p38_p4 = scmp.eq.s32.totalorder %s413_s10, 0 }
   0xa   : > { %s429_s15 = scalar_select %p22_p1, %s374_s8, %s24_s13  }
   0xb   : > { %p431_p5 = por %p32_p2, %p31_p0  ;;  %p435_p6 = por %p38_p4, %p37_p3 }
   0xc   : > { %p61_p7 = scmp.eq.s32.totalorder %s413_s10, 1  ;;  %p67_p8 = scmp.eq.s32.totalorder %s222_s11, 1 }
   0xd   : > { %p246_p10 = scmp.lt.s32.totalorder %s378_s9, 2  ;;  %s87_s20 = sand.u32 1, %s374_s8  }
   0xe   : > { %p442_p11 = por %p61_p7, %p31_p0  ;;  %p446_p12 = por %p67_p8, %p37_p3 }
   0xf   : > { %s226_s21 = sshll.u32 %s378_s9, 7  ;;  %s225_s22 = sshll.u32 %s87_s20, 3 }
  0x10   : > { %s558_s18 = scalar_select %p442_p11, 1, 0 }
  0x11   : > { %s559_s19 = scalar_select %p446_p12, 1, 0 }
  0x12   : > { %s455_s25 = scalar_lea.hbm %s553_s0, %s226_s21  ;;  %s91_s26 = scalar_lea.vmem [#allocation2], %s225_s22 }
  0x13   : > { %s98_s27 = sshll.u32 %s91_s26, 4  ;;  %p459_p13 = pnand %p246_p10, %p431_p5  ;;  %s463_s27 = int_to_ptr.vmem [resolvable:$true] %s98_s27 }
  0x14   : > { %s88_s29 = scalar_lea.sflag [#allocation3], %s87_s20  ;;  %s282_s30 = scalar_lea.hbm %s455_s25, 128 }
  0x15   : > { %p283_p2 = scmp.ne.s32.totalorder %s455_s25, %s282_s30  ;;  %p284_p3 = pneg %p459_p13 }
  0x16   : > { %s287_s4 = scalar_lea.hbm %s553_s0, 256  ;;  %p288_p5 = scmp.lt.u32.totalorder %s455_s25, %s553_s0 }
  0x17   : > { %p285_p4 = pnand %p284_p3, %p283_p2  ;;  %p289_p8 = scmp.lt.u32.totalorder %s287_s4, %s282_s30 }
  0x18   : > { %p291_p9 = scmp.lt.u32.totalorder %s282_s30, %s455_s25 }
  0x19   : > { %p286_p7 = pneg %p285_p4  ;;  %p290_p10 = por %p289_p8, %p288_p5 }
  0x1b   : > { %p292_p0 = por %p291_p9, %p290_p10 }
  0x1d   : > { %p293_p1 = pnand %p292_p0, %p286_p7 }
  0x1f   : > { %296 = shalt.err (!%p293_p1)
}
  0x20   : > { %s297_s13 = scalar_lea.vmem %s463_s27, 128  ;;  %s380_s14 = smov [#allocation2]  }
  0x21   : > { %p298_p2 = scmp.ne.s32.totalorder %s463_s27, %s297_s13  ;;  %s302_s16 = sshll.u32 %s380_s14, 4  ;;  %s303_s16 = int_to_ptr.vmem [resolvable:$false] %s302_s16 }
  0x22   : > { %s304_s20 = scalar_lea.vmem %s303_s16, 256  ;;  %p305_p11 = scmp.lt.s32.totalorder %s463_s27, %s303_s16 }
  0x23   : > { %p300_p4 = pnand %p298_p2, %p284_p3  ;;  %p306_p5 = scmp.lt.s32.totalorder %s304_s20, %s297_s13 }
  0x25   : > { %p301_p12 = pneg %p300_p4  ;;  %p307_p8 = por %p306_p5, %p305_p11 }
  0x27   : > { %p308_p9 = pnand %p307_p8, %p301_p12 }
  0x29   : > { %311 = shalt.err (!%p308_p9)
}
  0x2a   : > { %241 = dma.hbm_to_vmem [thread:$0]  (!%p459_p13), %s455_s25, 128, %s463_s27, %s88_s29  }
  0x2b   : > { %p561_p0 = scmp.lt.s32.totalorder %s378_s9, 3  ;;  %p562_p1 = scmp.ge.s32.totalorder %s378_s9, 1 }
  0x2d   : > { %p104_p3 = pnand %p562_p1, %p561_p0 }
  0x2e   : > { %s497_s21 = sand.u32 (!%p104_p3), 1, %s370_s7  }
  0x2f   : > { %107 = sbr.rel (%p104_p3) target bundleno = 87 (0x57), region = 24  ;;  %s228_s22 = sshll.u32 (!%p104_p3), %s497_s21, 3 }
  0x30   : > { %s110_s23 = scalar_lea.sflag (!%p104_p3), [#allocation3], %s497_s21  ;;  %s113_s24 = scalar_lea.vmem (!%p104_p3), [#allocation2], %s228_s22 }
  0x36   : > { %357 = dma.done.wait (%p435_p6), %s110_s23, 128  }
  0x37   : > { %359 = vsyncadd (%p435_p6), %s110_s23, 4294967168  ;;  %v132_v0 = vld [vmem:[%s113_s24] sm:$0xff]  ;;  %s131_s25 = scalar_lea.vmem [#allocation5], %s228_s22  ;;  %s231_s27 = sshll.u32 %s413_s10, 7 }
  0x38   : > { %v133_v1 = vmul.f32 0.5, %v132_v0  ;;  %s152_s26 = sshll.u32 %s131_s25, 4  ;;  %s511_s17 = scalar_lea.hbm %s554_s1, %s231_s27  ;;  %s506_s26 = int_to_ptr.vmem [resolvable:$true] %s152_s26 }
  0x39   : > { %s139_s30 = scalar_lea.sflag [#allocation4], %s497_s21  ;;  %s312_s2 = scalar_lea.vmem %s506_s26, 128 }
  0x3a   : > { %280 = vtanh.f32 %v133_v1  ;;  %p313_p6 = scmp.ne.s32.totalorder %s506_s26, %s312_s2  ;;  %p563_p11 = scmp.ne.s32.totalorder %s558_s18, 0 }
  0x3b   : > { %s381_s10 = smov [#allocation5]  }
  0x3c   : > { %p314_p12 = pnand %p313_p6, %p563_p11  ;;  %s316_s3 = sshll.u32 %s381_s10, 4  ;;  %s317_s3 = int_to_ptr.vmem [resolvable:$false] %s316_s3 }
  0x3d   : > { %s318_s4 = scalar_lea.vmem %s317_s3, 256  ;;  %p319_p7 = scmp.lt.s32.totalorder %s506_s26, %s317_s3 }
  0x3e   : > { %p315_p13 = pneg %p314_p12  ;;  %p320_p10 = scmp.lt.s32.totalorder %s318_s4, %s312_s2 }
  0x40   : > { %p321_p2 = por %p320_p10, %p319_p7 }
  0x42   : > { %p322_p4 = pnand %p321_p2, %p315_p13 }
  0x44   : > { %v281_v2 = vpop.eup %280 }
  0x45   : > { %v135_v3 = vmul.f32 %v281_v2, %v133_v1 }
  0x47   : > { %v136_v4 = vadd.f32 %v135_v3, %v133_v1 }
  0x49   : > { %137 = vst [vmem:[%s131_s25] sm:$0xff] %v136_v4 }
  0x4a   : > { %325 = shalt.err (!%p322_p4)
}
  0x4b   : > { %s326_s5 = scalar_lea.hbm %s511_s17, 128  ;;  %s330_s14 = scalar_lea.hbm %s554_s1, 256 }
  0x4c   : > { %p327_p5 = scmp.ne.s32.totalorder %s511_s17, %s326_s5  ;;  %p331_p0 = scmp.lt.u32.totalorder %s511_s17, %s554_s1 }
  0x4d   : > { %p332_p1 = scmp.lt.u32.totalorder %s330_s14, %s326_s5  ;;  %p334_p6 = scmp.lt.u32.totalorder %s326_s5, %s511_s17 }
  0x4e   : > { %p328_p8 = pnand %p327_p5, %p563_p11 }
  0x4f   : > { %p333_p3 = por %p332_p1, %p331_p0 }
  0x50   : > { %p329_p9 = pneg %p328_p8 }
  0x51   : > { %p335_p12 = por %p334_p6, %p333_p3 }
  0x53   : > { %p336_p13 = pnand %p335_p12, %p329_p9 }
  0x55   : > { %339 = shalt.err (!%p336_p13)
}
  0x56   : > { %236 = dma.vmem_to_hbm [thread:$0]  (%p563_p11), %s506_s26, 128, %s511_s17, %s139_s30  }
  0x57 PF: > { %s164_s21 = sand.u32 1, %s366_s6   ;;  %p564_p7 = scmp.ne.s32.totalorder %s559_s19, 0 }
  0x58   : > { %p565_p10 = scmp.ge.s32.totalorder %s378_s9, 2  ;;  %s165_s22 = scalar_lea.sflag [#allocation4], %s164_s21 }
  0x5a   : > { %p243_p2 = pnand %p565_p10, %p564_p7 }
  0x5c   : > { %361 = dma.done.wait (!%p243_p2), %s165_s22, 128  }
  0x5d   : > { %363 = vsyncadd (!%p243_p2), %s165_s22, 4294967168  ;;  %p14_p4 = scmp.ge.s32.totalorder %s417_s12, 4   ;;  %s566_s6 = smov %s370_s7 }
  0x5e   : > { %s567_s7 = smov %s374_s8  ;;  %s568_s8 = smov %s429_s15 }
  0x5f   : > { %s569_s9 = smov %s417_s12  ;;  %16 = sbr.rel (!%p14_p4) target bundleno = 5 (0x5), region = 69 }
  0x66   :  { %170 = vsyncpa [#allocation3], 1 }
  0x67   :  { %172 = vsyncpa [#allocation3 + $0x1], 1 }
  0x68   :  { %173 = vsyncpa [#allocation4], 1 }
  0x69   :  { %175 = vsyncpa [#allocation4 + $0x1], 1 }

</bundles_post_ra>
